<compile_context>
chip_gen: v5e
topology: v5e:2x2
jax: 0.10.0
libtpu: 0.0.40
codegen_flags: <defaults>
</compile_context>

<pallas_src>
import jax
import jax.numpy as jnp
import numpy as np
from jax.experimental import pallas as pl
from jax.experimental.pallas import tpu as pltpu


_OUT_LANES = 128            # lane-dense merged output slab (one full vreg row)
_VAL_COL, _LOGP_COL, _ENT_COL = 0, 1, 2


# ----------------------------- Pallas kernel ------------------------------ #
def a2c_eval_kernel(obs_ref, act_ref, mask_ref,
                    w1f_ref, b1f_ref,
                    aw2_ref, ab2_ref, aw3_ref, ab3_ref,
                    cw2_ref, cb2_ref, cw3_ref, cb3_ref,
                    out_ref):
    n_agents, B, _ = obs_ref.shape
    H = cw2_ref.shape[-1]
    A = mask_ref.shape[-1]

    # hoisted iotas (shared by every agent iteration)
    lane = jax.lax.broadcasted_iota(jnp.int32, (B, _OUT_LANES), 1)
    act_iota = jax.lax.broadcasted_iota(jnp.int32, (B, A), 1)

    for a in range(n_agents):          # static unroll; all agents, one launch
        x = obs_ref[a]                                          # (B, D)

        # ---- fused first layer:  relu(x @ [cw1 | aw1] + [cb1 | ab1]) ----
        y1 = jnp.maximum(
            jnp.dot(x, w1f_ref[a], preferred_element_type=jnp.float32)
            + b1f_ref[a], 0.0)                                  # (B, 2H)
        h = y1[:, :H]                                           # critic hidden
        g = y1[:, H:]                                           # actor hidden

        # ---- critic tail:  H -> H -> 1 ----
        h = jnp.maximum(
            jnp.dot(h, cw2_ref[a], preferred_element_type=jnp.float32)
            + cb2_ref[a], 0.0)
        v = jnp.dot(h, cw3_ref[a], preferred_element_type=jnp.float32) \
            + cb3_ref[a]                                        # (B, 1)

        # ---- actor tail:  H -> H -> A ----
        g = jnp.maximum(
            jnp.dot(g, aw2_ref[a], preferred_element_type=jnp.float32)
            + ab2_ref[a], 0.0)
        logits = jnp.dot(g, aw3_ref[a], preferred_element_type=jnp.float32) \
            + ab3_ref[a]                                        # (B, A)

        # action-mask semantics from get_dist():  l*m + (1-m)*(-1e8)
        m = mask_ref[a]
        logits = logits * m + (1.0 - m) * (-1e8)

        # numerically-stable log-softmax (Categorical(logits=...))
        zmax = jnp.max(logits, axis=-1, keepdims=True)
        z = logits - zmax
        ez = jnp.exp(z)
        sez = jnp.sum(ez, axis=-1, keepdims=True)
        logp = z - jnp.log(sez)                                 # (B, A)
        p = ez * pl.reciprocal(sez, approx=False)               # EUP, not VALU

        # log-prob of the taken action via one-hot gather
        a_id = act_ref[a]                                       # (B, 1) int32
        onehot = (act_iota == a_id).astype(jnp.float32)
        lp_taken = jnp.sum(logp * onehot, axis=-1, keepdims=True)   # (B, 1)

        # per-agent entropy:  -sum_a p * log p
        ent = -jnp.sum(p * logp, axis=-1, keepdims=True)            # (B, 1)

        # lane-dense merged output slab: col0=value, col1=logp, col2=entropy
        slab = jnp.where(lane == _VAL_COL, v,
               jnp.where(lane == _LOGP_COL, lp_taken,
               jnp.where(lane == _ENT_COL, ent, 0.0)))              # (B, 128)
        out_ref[a] = slab


# ------------------------------- wrapper ----------------------------------- #
@jax.jit
def evaluate_actions(obs, actions, action_mask, actor_params, critic_params):
    """Pallas port of A2CNetwork.evaluate_actions (MLP, independent networks).

    Returns:
      values           (B, n_agents)
      action_log_probs (B, n_agents)
      dist_entropy     (B,)            -- summed over agents, like the module
    """
    n_agents, B, _ = obs.shape

    aw1, ab1, aw2, ab2, aw3, ab3 = actor_params
    cw1, cb1, cw2, cb2, cw3, cb3 = critic_params

    # Fuse the shared-input first layers: one (D, 2H) matmul per agent.
    w1f = jnp.concatenate([cw1, aw1], axis=-1)        # (n_agents, D, 2H)
    b1f = jnp.concatenate([cb1, ab1], axis=-1)        # (n_agents, 1, 2H)

    vmem_spec = pl.BlockSpec(memory_space=pltpu.MemorySpace.VMEM)

    out = pl.pallas_call(
        a2c_eval_kernel,
        out_shape=jax.ShapeDtypeStruct((n_agents, B, _OUT_LANES), jnp.float32),
        in_specs=[vmem_spec] * 13,
        out_specs=vmem_spec,
    )(obs, actions, action_mask,
      w1f, b1f, aw2, ab2, aw3, ab3, cw2, cb2, cw3, cb3)

    values = jnp.transpose(out[:, :, _VAL_COL])           # torch.cat(values, -1)
    action_log_probs = jnp.transpose(out[:, :, _LOGP_COL])
    dist_entropy = jnp.sum(out[:, :, _ENT_COL], axis=0)   # stack(...,-1).sum(-1)
    return values, action_log_probs, dist_entropy


# -------------------------- pure-JAX reference ----------------------------- #
def _reference(obs, actions, action_mask, actor_params, critic_params):
    aw1, ab1, aw2, ab2, aw3, ab3 = actor_params
    cw1, cb1, cw2, cb2, cw3, cb3 = critic_params
    vals, lps, ents = [], [], []
    for a in range(obs.shape[0]):
        x = obs[a]
        h = jnp.maximum(x @ cw1[a] + cb1[a], 0.0)
        h = jnp.maximum(h @ cw2[a] + cb2[a], 0.0)
        vals.append(h @ cw3[a] + cb3[a])
        g = jnp.maximum(x @ aw1[a] + ab1[a], 0.0)
        g = jnp.maximum(g @ aw2[a] + ab2[a], 0.0)
        logits = g @ aw3[a] + ab3[a]
        m = action_mask[a]
        logits = logits * m + (1.0 - m) * (-1e8)
        logp = jax.nn.log_softmax(logits, axis=-1)
        p = jax.nn.softmax(logits, axis=-1)
        lps.append(jnp.take_along_axis(logp, actions[a], axis=-1))
        ents.append(-jnp.sum(p * logp, axis=-1, keepdims=True))
    values = jnp.concatenate(vals, axis=-1)
    action_log_probs = jnp.concatenate(lps, axis=-1)
    entropy = jnp.sum(jnp.concatenate(ents, axis=-1), axis=-1)
    return values, action_log_probs, entropy


# --------------------------------- main ------------------------------------ #
if __name__ == "__main__":
    n_agents, B, D, H, A = 2, 8, 16, 32, 5

    key = jax.random.PRNGKey(0)
    ks = jax.random.split(key, 16)

    obs = jax.random.normal(ks[0], (n_agents, B, D), dtype=jnp.float32)
    actions = jax.random.randint(ks[1], (n_agents, B, 1), 0, A).astype(jnp.int32)
    # mask one random action per (agent, batch) entry, keep the taken one valid
    rand_masked = jax.random.randint(ks[2], (n_agents, B, 1), 0, A)
    ar = jnp.arange(A)[None, None, :]
    action_mask = jnp.where((ar == rand_masked) & (ar != actions), 0.0, 1.0
                            ).astype(jnp.float32)

    def mk(k, shape, scale):
        return (scale * jax.random.normal(k, shape)).astype(jnp.float32)

    actor_params = (
        mk(ks[3], (n_agents, D, H), 0.3), mk(ks[4], (n_agents, 1, H), 0.1),
        mk(ks[5], (n_agents, H, H), 0.2), mk(ks[6], (n_agents, 1, H), 0.1),
        mk(ks[7], (n_agents, H, A), 0.2), mk(ks[8], (n_agents, 1, A), 0.1),
    )
    critic_params = (
        mk(ks[9],  (n_agents, D, H), 0.3), mk(ks[10], (n_agents, 1, H), 0.1),
        mk(ks[11], (n_agents, H, H), 0.2), mk(ks[12], (n_agents, 1, H), 0.1),
        mk(ks[13], (n_agents, H, 1), 0.2), mk(ks[14], (n_agents, 1, 1), 0.1),
    )

    values, logps, entropy = evaluate_actions(
        obs, actions, action_mask, actor_params, critic_params)
    jax.block_until_ready((values, logps, entropy))

    rv, rlp, re = _reference(obs, actions, action_mask, actor_params,
                             critic_params)
    np.testing.assert_allclose(np.asarray(values), np.asarray(rv),
                               rtol=1e-5, atol=1e-5)
    np.testing.assert_allclose(np.asarray(logps), np.asarray(rlp),
                               rtol=1e-5, atol=1e-5)
    np.testing.assert_allclose(np.asarray(entropy), np.asarray(re),
                               rtol=1e-5, atol=1e-5)

    print("KERNEL_OK")
</pallas_src>

<mosaic_0001>
module attributes {stable_mosaic.version = 11 : i64} {
  func.func @a2c_eval_kernel(%arg0: memref<2x8x16xf32, #tpu.memory_space<vmem>>, %arg1: memref<2x8x1xi32, #tpu.memory_space<vmem>>, %arg2: memref<2x8x5xf32, #tpu.memory_space<vmem>>, %arg3: memref<2x16x64xf32, #tpu.memory_space<vmem>>, %arg4: memref<2x1x64xf32, #tpu.memory_space<vmem>>, %arg5: memref<2x32x32xf32, #tpu.memory_space<vmem>>, %arg6: memref<2x1x32xf32, #tpu.memory_space<vmem>>, %arg7: memref<2x32x5xf32, #tpu.memory_space<vmem>>, %arg8: memref<2x1x5xf32, #tpu.memory_space<vmem>>, %arg9: memref<2x32x32xf32, #tpu.memory_space<vmem>>, %arg10: memref<2x1x32xf32, #tpu.memory_space<vmem>>, %arg11: memref<2x32x1xf32, #tpu.memory_space<vmem>>, %arg12: memref<2x1x1xf32, #tpu.memory_space<vmem>>, %arg13: memref<2x8x128xf32, #tpu.memory_space<vmem>>) attributes {dimension_semantics = [], scalar_prefetch = 0 : i64, scratch_operands = 0 : i64, tpu.core_type = #tpu.core_type<tc>} {
    %0 = tpu.iota {dimensions = array<i32: 1>} : vector<8x128xi32>
    %1 = tpu.iota {dimensions = array<i32: 1>} : vector<8x5xi32>
    %c0 = arith.constant 0 : index
    %c0_0 = arith.constant 0 : index
    %c0_1 = arith.constant 0 : index
    %2 = vector.load %arg0[%c0, %c0_0, %c0_1] : memref<2x8x16xf32, #tpu.memory_space<vmem>>, vector<1x8x16xf32>
    %3 = vector.shape_cast %2 : vector<1x8x16xf32> to vector<8x16xf32>
    %c0_2 = arith.constant 0 : index
    %c0_3 = arith.constant 0 : index
    %c0_4 = arith.constant 0 : index
    %4 = vector.load %arg3[%c0_2, %c0_3, %c0_4] : memref<2x16x64xf32, #tpu.memory_space<vmem>>, vector<1x16x64xf32>
    %5 = vector.shape_cast %4 : vector<1x16x64xf32> to vector<16x64xf32>
    %cst = arith.constant dense<0.000000e+00> : vector<8x64xf32>
    %6 = tpu.matmul %3, %5, %cst {dimension_numbers = #tpu.dot_dimension_numbers<[1], [0], [0], [1], [0, 0, 1, 1], [], []>} : vector<8x16xf32>, vector<16x64xf32>, vector<8x64xf32> -> vector<8x64xf32>
    %c0_5 = arith.constant 0 : index
    %c0_6 = arith.constant 0 : index
    %c0_7 = arith.constant 0 : index
    %7 = vector.load %arg4[%c0_5, %c0_6, %c0_7] : memref<2x1x64xf32, #tpu.memory_space<vmem>>, vector<1x1x64xf32>
    %8 = vector.shape_cast %7 : vector<1x1x64xf32> to vector<1x64xf32>
    %9 = vector.broadcast %8 : vector<1x64xf32> to vector<8x64xf32>
    %10 = arith.addf %6, %9 : vector<8x64xf32>
    %cst_8 = arith.constant 0.000000e+00 : f32
    %11 = vector.broadcast %cst_8 : f32 to vector<8x64xf32>
    %12 = arith.maximumf %10, %11 : vector<8x64xf32>
    %13 = vector.extract_strided_slice %12 {offsets = [0, 0], sizes = [8, 32], strides = [1, 1]} : vector<8x64xf32> to vector<8x32xf32>
    %14 = vector.extract_strided_slice %12 {offsets = [0, 32], sizes = [8, 32], strides = [1, 1]} : vector<8x64xf32> to vector<8x32xf32>
    %c0_9 = arith.constant 0 : index
    %c0_10 = arith.constant 0 : index
    %c0_11 = arith.constant 0 : index
    %15 = vector.load %arg9[%c0_9, %c0_10, %c0_11] : memref<2x32x32xf32, #tpu.memory_space<vmem>>, vector<1x32x32xf32>
    %16 = vector.shape_cast %15 : vector<1x32x32xf32> to vector<32x32xf32>
    %cst_12 = arith.constant dense<0.000000e+00> : vector<8x32xf32>
    %17 = tpu.matmul %13, %16, %cst_12 {dimension_numbers = #tpu.dot_dimension_numbers<[1], [0], [0], [1], [0, 0, 1, 1], [], []>} : vector<8x32xf32>, vector<32x32xf32>, vector<8x32xf32> -> vector<8x32xf32>
    %c0_13 = arith.constant 0 : index
    %c0_14 = arith.constant 0 : index
    %c0_15 = arith.constant 0 : index
    %18 = vector.load %arg10[%c0_13, %c0_14, %c0_15] : memref<2x1x32xf32, #tpu.memory_space<vmem>>, vector<1x1x32xf32>
    %19 = vector.shape_cast %18 : vector<1x1x32xf32> to vector<1x32xf32>
    %20 = vector.broadcast %19 : vector<1x32xf32> to vector<8x32xf32>
    %21 = arith.addf %17, %20 : vector<8x32xf32>
    %cst_16 = arith.constant 0.000000e+00 : f32
    %22 = vector.broadcast %cst_16 : f32 to vector<8x32xf32>
    %23 = arith.maximumf %21, %22 : vector<8x32xf32>
    %c0_17 = arith.constant 0 : index
    %c0_18 = arith.constant 0 : index
    %c0_19 = arith.constant 0 : index
    %24 = vector.load %arg11[%c0_17, %c0_18, %c0_19] : memref<2x32x1xf32, #tpu.memory_space<vmem>>, vector<1x32x1xf32>
    %25 = vector.shape_cast %24 : vector<1x32x1xf32> to vector<32x1xf32>
    %cst_20 = arith.constant dense<0.000000e+00> : vector<8x1xf32>
    %26 = tpu.matmul %23, %25, %cst_20 {dimension_numbers = #tpu.dot_dimension_numbers<[1], [0], [0], [1], [0, 0, 1, 1], [], []>} : vector<8x32xf32>, vector<32x1xf32>, vector<8x1xf32> -> vector<8x1xf32>
    %c0_21 = arith.constant 0 : index
    %c0_22 = arith.constant 0 : index
    %c0_23 = arith.constant 0 : index
    %27 = vector.load %arg12[%c0_21, %c0_22, %c0_23] : memref<2x1x1xf32, #tpu.memory_space<vmem>>, vector<1x1x1xf32>
    %28 = vector.shape_cast %27 : vector<1x1x1xf32> to vector<1x1xf32>
    %29 = vector.broadcast %28 : vector<1x1xf32> to vector<8x1xf32>
    %30 = arith.addf %26, %29 : vector<8x1xf32>
    %c0_24 = arith.constant 0 : index
    %c0_25 = arith.constant 0 : index
    %c0_26 = arith.constant 0 : index
    %31 = vector.load %arg5[%c0_24, %c0_25, %c0_26] : memref<2x32x32xf32, #tpu.memory_space<vmem>>, vector<1x32x32xf32>
    %32 = vector.shape_cast %31 : vector<1x32x32xf32> to vector<32x32xf32>
    %cst_27 = arith.constant dense<0.000000e+00> : vector<8x32xf32>
    %33 = tpu.matmul %14, %32, %cst_27 {dimension_numbers = #tpu.dot_dimension_numbers<[1], [0], [0], [1], [0, 0, 1, 1], [], []>} : vector<8x32xf32>, vector<32x32xf32>, vector<8x32xf32> -> vector<8x32xf32>
    %c0_28 = arith.constant 0 : index
    %c0_29 = arith.constant 0 : index
    %c0_30 = arith.constant 0 : index
    %34 = vector.load %arg6[%c0_28, %c0_29, %c0_30] : memref<2x1x32xf32, #tpu.memory_space<vmem>>, vector<1x1x32xf32>
    %35 = vector.shape_cast %34 : vector<1x1x32xf32> to vector<1x32xf32>
    %36 = vector.broadcast %35 : vector<1x32xf32> to vector<8x32xf32>
    %37 = arith.addf %33, %36 : vector<8x32xf32>
    %cst_31 = arith.constant 0.000000e+00 : f32
    %38 = vector.broadcast %cst_31 : f32 to vector<8x32xf32>
    %39 = arith.maximumf %37, %38 : vector<8x32xf32>
    %c0_32 = arith.constant 0 : index
    %c0_33 = arith.constant 0 : index
    %c0_34 = arith.constant 0 : index
    %40 = vector.load %arg7[%c0_32, %c0_33, %c0_34] : memref<2x32x5xf32, #tpu.memory_space<vmem>>, vector<1x32x5xf32>
    %41 = vector.shape_cast %40 : vector<1x32x5xf32> to vector<32x5xf32>
    %cst_35 = arith.constant dense<0.000000e+00> : vector<8x5xf32>
    %42 = tpu.matmul %39, %41, %cst_35 {dimension_numbers = #tpu.dot_dimension_numbers<[1], [0], [0], [1], [0, 0, 1, 1], [], []>} : vector<8x32xf32>, vector<32x5xf32>, vector<8x5xf32> -> vector<8x5xf32>
    %c0_36 = arith.constant 0 : index
    %c0_37 = arith.constant 0 : index
    %c0_38 = arith.constant 0 : index
    %43 = vector.load %arg8[%c0_36, %c0_37, %c0_38] : memref<2x1x5xf32, #tpu.memory_space<vmem>>, vector<1x1x5xf32>
    %44 = vector.shape_cast %43 : vector<1x1x5xf32> to vector<1x5xf32>
    %45 = vector.broadcast %44 : vector<1x5xf32> to vector<8x5xf32>
    %46 = arith.addf %42, %45 : vector<8x5xf32>
    %c0_39 = arith.constant 0 : index
    %c0_40 = arith.constant 0 : index
    %c0_41 = arith.constant 0 : index
    %47 = vector.load %arg2[%c0_39, %c0_40, %c0_41] : memref<2x8x5xf32, #tpu.memory_space<vmem>>, vector<1x8x5xf32>
    %48 = vector.shape_cast %47 : vector<1x8x5xf32> to vector<8x5xf32>
    %49 = arith.mulf %46, %48 : vector<8x5xf32>
    %cst_42 = arith.constant 1.000000e+00 : f32
    %50 = vector.broadcast %cst_42 : f32 to vector<8x5xf32>
    %51 = arith.subf %50, %48 : vector<8x5xf32>
    %cst_43 = arith.constant -1.000000e+08 : f32
    %52 = vector.broadcast %cst_43 : f32 to vector<8x5xf32>
    %53 = arith.mulf %51, %52 : vector<8x5xf32>
    %54 = arith.addf %49, %53 : vector<8x5xf32>
    %cst_44 = arith.constant dense<0xFF800000> : vector<8xf32>
    %55 = vector.multi_reduction <maximumf>, %54, %cst_44 [1] : vector<8x5xf32> to vector<8xf32>
    %56 = vector.shape_cast %55 : vector<8xf32> to vector<8x1xf32>
    %57 = vector.broadcast %56 : vector<8x1xf32> to vector<8x5xf32>
    %58 = arith.subf %54, %57 : vector<8x5xf32>
    %59 = math.exp %58 : vector<8x5xf32>
    %cst_45 = arith.constant dense<0.000000e+00> : vector<8xf32>
    %60 = vector.multi_reduction <add>, %59, %cst_45 [1] : vector<8x5xf32> to vector<8xf32>
    %61 = vector.shape_cast %60 : vector<8xf32> to vector<8x1xf32>
    %62 = math.log %61 : vector<8x1xf32>
    %63 = vector.broadcast %62 : vector<8x1xf32> to vector<8x5xf32>
    %64 = arith.subf %58, %63 : vector<8x5xf32>
    %65 = tpu.reciprocal %61 : vector<8x1xf32> -> vector<8x1xf32>
    %66 = vector.broadcast %65 : vector<8x1xf32> to vector<8x5xf32>
    %67 = arith.mulf %59, %66 : vector<8x5xf32>
    %c0_46 = arith.constant 0 : index
    %c0_47 = arith.constant 0 : index
    %c0_48 = arith.constant 0 : index
    %68 = vector.load %arg1[%c0_46, %c0_47, %c0_48] : memref<2x8x1xi32, #tpu.memory_space<vmem>>, vector<1x8x1xi32>
    %69 = vector.shape_cast %68 : vector<1x8x1xi32> to vector<8x1xi32>
    %70 = vector.broadcast %69 : vector<8x1xi32> to vector<8x5xi32>
    %71 = arith.cmpi eq, %1, %70 : vector<8x5xi32>
    %72 = arith.extui %71 : vector<8x5xi1> to vector<8x5xi32>
    %73 = arith.sitofp %72 : vector<8x5xi32> to vector<8x5xf32>
    %74 = arith.mulf %64, %73 : vector<8x5xf32>
    %cst_49 = arith.constant dense<0.000000e+00> : vector<8xf32>
    %75 = vector.multi_reduction <add>, %74, %cst_49 [1] : vector<8x5xf32> to vector<8xf32>
    %76 = vector.shape_cast %75 : vector<8xf32> to vector<8x1xf32>
    %77 = arith.mulf %67, %64 : vector<8x5xf32>
    %cst_50 = arith.constant dense<0.000000e+00> : vector<8xf32>
    %78 = vector.multi_reduction <add>, %77, %cst_50 [1] : vector<8x5xf32> to vector<8xf32>
    %79 = vector.shape_cast %78 : vector<8xf32> to vector<8x1xf32>
    %cst_51 = arith.constant 0.000000e+00 : f32
    %80 = vector.broadcast %cst_51 : f32 to vector<8x1xf32>
    %81 = arith.subf %80, %79 : vector<8x1xf32>
    %c0_i32 = arith.constant 0 : i32
    %82 = vector.broadcast %c0_i32 : i32 to vector<8x128xi32>
    %83 = arith.cmpi eq, %0, %82 : vector<8x128xi32>
    %c1_i32 = arith.constant 1 : i32
    %84 = vector.broadcast %c1_i32 : i32 to vector<8x128xi32>
    %85 = arith.cmpi eq, %0, %84 : vector<8x128xi32>
    %c2_i32 = arith.constant 2 : i32
    %86 = vector.broadcast %c2_i32 : i32 to vector<8x128xi32>
    %87 = arith.cmpi eq, %0, %86 : vector<8x128xi32>
    %cst_52 = arith.constant 0.000000e+00 : f32
    %88 = vector.shape_cast %81 : vector<8x1xf32> to vector<8x1xf32>
    %89 = vector.broadcast %88 : vector<8x1xf32> to vector<8x128xf32>
    %90 = vector.broadcast %cst_52 : f32 to vector<8x128xf32>
    %91 = arith.select %87, %89, %90 : vector<8x128xi1>, vector<8x128xf32>
    %92 = vector.shape_cast %76 : vector<8x1xf32> to vector<8x1xf32>
    %93 = vector.broadcast %92 : vector<8x1xf32> to vector<8x128xf32>
    %94 = arith.select %85, %93, %91 : vector<8x128xi1>, vector<8x128xf32>
    %95 = vector.shape_cast %30 : vector<8x1xf32> to vector<8x1xf32>
    %96 = vector.broadcast %95 : vector<8x1xf32> to vector<8x128xf32>
    %97 = arith.select %83, %96, %94 : vector<8x128xi1>, vector<8x128xf32>
    %c0_53 = arith.constant 0 : index
    %c0_54 = arith.constant 0 : index
    %c0_55 = arith.constant 0 : index
    %98 = vector.load %arg13[%c0_53, %c0_54, %c0_55] : memref<2x8x128xf32, #tpu.memory_space<vmem>>, vector<1x8x128xf32>
    %99 = vector.shape_cast %98 : vector<1x8x128xf32> to vector<8x128xf32>
    %100 = vector.shape_cast %97 : vector<8x128xf32> to vector<1x8x128xf32>
    tpu.vector_store %arg13[%c0_53, %c0_54, %c0_55], %100 {strides = array<i32>} : memref<2x8x128xf32, #tpu.memory_space<vmem>>, vector<1x8x128xf32>,
    %c1 = arith.constant 1 : index
    %c0_56 = arith.constant 0 : index
    %c0_57 = arith.constant 0 : index
    %101 = vector.load %arg0[%c1, %c0_56, %c0_57] : memref<2x8x16xf32, #tpu.memory_space<vmem>>, vector<1x8x16xf32>
    %102 = vector.shape_cast %101 : vector<1x8x16xf32> to vector<8x16xf32>
    %c1_58 = arith.constant 1 : index
    %c0_59 = arith.constant 0 : index
    %c0_60 = arith.constant 0 : index
    %103 = vector.load %arg3[%c1_58, %c0_59, %c0_60] : memref<2x16x64xf32, #tpu.memory_space<vmem>>, vector<1x16x64xf32>
    %104 = vector.shape_cast %103 : vector<1x16x64xf32> to vector<16x64xf32>
    %cst_61 = arith.constant dense<0.000000e+00> : vector<8x64xf32>
    %105 = tpu.matmul %102, %104, %cst_61 {dimension_numbers = #tpu.dot_dimension_numbers<[1], [0], [0], [1], [0, 0, 1, 1], [], []>} : vector<8x16xf32>, vector<16x64xf32>, vector<8x64xf32> -> vector<8x64xf32>
    %c1_62 = arith.constant 1 : index
    %c0_63 = arith.constant 0 : index
    %c0_64 = arith.constant 0 : index
    %106 = vector.load %arg4[%c1_62, %c0_63, %c0_64] : memref<2x1x64xf32, #tpu.memory_space<vmem>>, vector<1x1x64xf32>
    %107 = vector.shape_cast %106 : vector<1x1x64xf32> to vector<1x64xf32>
    %108 = vector.broadcast %107 : vector<1x64xf32> to vector<8x64xf32>
    %109 = arith.addf %105, %108 : vector<8x64xf32>
    %cst_65 = arith.constant 0.000000e+00 : f32
    %110 = vector.broadcast %cst_65 : f32 to vector<8x64xf32>
    %111 = arith.maximumf %109, %110 : vector<8x64xf32>
    %112 = vector.extract_strided_slice %111 {offsets = [0, 0], sizes = [8, 32], strides = [1, 1]} : vector<8x64xf32> to vector<8x32xf32>
    %113 = vector.extract_strided_slice %111 {offsets = [0, 32], sizes = [8, 32], strides = [1, 1]} : vector<8x64xf32> to vector<8x32xf32>
    %c1_66 = arith.constant 1 : index
    %c0_67 = arith.constant 0 : index
    %c0_68 = arith.constant 0 : index
    %114 = vector.load %arg9[%c1_66, %c0_67, %c0_68] : memref<2x32x32xf32, #tpu.memory_space<vmem>>, vector<1x32x32xf32>
    %115 = vector.shape_cast %114 : vector<1x32x32xf32> to vector<32x32xf32>
    %cst_69 = arith.constant dense<0.000000e+00> : vector<8x32xf32>
    %116 = tpu.matmul %112, %115, %cst_69 {dimension_numbers = #tpu.dot_dimension_numbers<[1], [0], [0], [1], [0, 0, 1, 1], [], []>} : vector<8x32xf32>, vector<32x32xf32>, vector<8x32xf32> -> vector<8x32xf32>
    %c1_70 = arith.constant 1 : index
    %c0_71 = arith.constant 0 : index
    %c0_72 = arith.constant 0 : index
    %117 = vector.load %arg10[%c1_70, %c0_71, %c0_72] : memref<2x1x32xf32, #tpu.memory_space<vmem>>, vector<1x1x32xf32>
    %118 = vector.shape_cast %117 : vector<1x1x32xf32> to vector<1x32xf32>
    %119 = vector.broadcast %118 : vector<1x32xf32> to vector<8x32xf32>
    %120 = arith.addf %116, %119 : vector<8x32xf32>
    %cst_73 = arith.constant 0.000000e+00 : f32
    %121 = vector.broadcast %cst_73 : f32 to vector<8x32xf32>
    %122 = arith.maximumf %120, %121 : vector<8x32xf32>
    %c1_74 = arith.constant 1 : index
    %c0_75 = arith.constant 0 : index
    %c0_76 = arith.constant 0 : index
    %123 = vector.load %arg11[%c1_74, %c0_75, %c0_76] : memref<2x32x1xf32, #tpu.memory_space<vmem>>, vector<1x32x1xf32>
    %124 = vector.shape_cast %123 : vector<1x32x1xf32> to vector<32x1xf32>
    %cst_77 = arith.constant dense<0.000000e+00> : vector<8x1xf32>
    %125 = tpu.matmul %122, %124, %cst_77 {dimension_numbers = #tpu.dot_dimension_numbers<[1], [0], [0], [1], [0, 0, 1, 1], [], []>} : vector<8x32xf32>, vector<32x1xf32>, vector<8x1xf32> -> vector<8x1xf32>
    %c1_78 = arith.constant 1 : index
    %c0_79 = arith.constant 0 : index
    %c0_80 = arith.constant 0 : index
    %126 = vector.load %arg12[%c1_78, %c0_79, %c0_80] : memref<2x1x1xf32, #tpu.memory_space<vmem>>, vector<1x1x1xf32>
    %127 = vector.shape_cast %126 : vector<1x1x1xf32> to vector<1x1xf32>
    %128 = vector.broadcast %127 : vector<1x1xf32> to vector<8x1xf32>
    %129 = arith.addf %125, %128 : vector<8x1xf32>
    %c1_81 = arith.constant 1 : index
    %c0_82 = arith.constant 0 : index
    %c0_83 = arith.constant 0 : index
    %130 = vector.load %arg5[%c1_81, %c0_82, %c0_83] : memref<2x32x32xf32, #tpu.memory_space<vmem>>, vector<1x32x32xf32>
    %131 = vector.shape_cast %130 : vector<1x32x32xf32> to vector<32x32xf32>
    %cst_84 = arith.constant dense<0.000000e+00> : vector<8x32xf32>
    %132 = tpu.matmul %113, %131, %cst_84 {dimension_numbers = #tpu.dot_dimension_numbers<[1], [0], [0], [1], [0, 0, 1, 1], [], []>} : vector<8x32xf32>, vector<32x32xf32>, vector<8x32xf32> -> vector<8x32xf32>
    %c1_85 = arith.constant 1 : index
    %c0_86 = arith.constant 0 : index
    %c0_87 = arith.constant 0 : index
    %133 = vector.load %arg6[%c1_85, %c0_86, %c0_87] : memref<2x1x32xf32, #tpu.memory_space<vmem>>, vector<1x1x32xf32>
    %134 = vector.shape_cast %133 : vector<1x1x32xf32> to vector<1x32xf32>
    %135 = vector.broadcast %134 : vector<1x32xf32> to vector<8x32xf32>
    %136 = arith.addf %132, %135 : vector<8x32xf32>
    %cst_88 = arith.constant 0.000000e+00 : f32
    %137 = vector.broadcast %cst_88 : f32 to vector<8x32xf32>
    %138 = arith.maximumf %136, %137 : vector<8x32xf32>
    %c1_89 = arith.constant 1 : index
    %c0_90 = arith.constant 0 : index
    %c0_91 = arith.constant 0 : index
    %139 = vector.load %arg7[%c1_89, %c0_90, %c0_91] : memref<2x32x5xf32, #tpu.memory_space<vmem>>, vector<1x32x5xf32>
    %140 = vector.shape_cast %139 : vector<1x32x5xf32> to vector<32x5xf32>
    %cst_92 = arith.constant dense<0.000000e+00> : vector<8x5xf32>
    %141 = tpu.matmul %138, %140, %cst_92 {dimension_numbers = #tpu.dot_dimension_numbers<[1], [0], [0], [1], [0, 0, 1, 1], [], []>} : vector<8x32xf32>, vector<32x5xf32>, vector<8x5xf32> -> vector<8x5xf32>
    %c1_93 = arith.constant 1 : index
    %c0_94 = arith.constant 0 : index
    %c0_95 = arith.constant 0 : index
    %142 = vector.load %arg8[%c1_93, %c0_94, %c0_95] : memref<2x1x5xf32, #tpu.memory_space<vmem>>, vector<1x1x5xf32>
    %143 = vector.shape_cast %142 : vector<1x1x5xf32> to vector<1x5xf32>
    %144 = vector.broadcast %143 : vector<1x5xf32> to vector<8x5xf32>
    %145 = arith.addf %141, %144 : vector<8x5xf32>
    %c1_96 = arith.constant 1 : index
    %c0_97 = arith.constant 0 : index
    %c0_98 = arith.constant 0 : index
    %146 = vector.load %arg2[%c1_96, %c0_97, %c0_98] : memref<2x8x5xf32, #tpu.memory_space<vmem>>, vector<1x8x5xf32>
    %147 = vector.shape_cast %146 : vector<1x8x5xf32> to vector<8x5xf32>
    %148 = arith.mulf %145, %147 : vector<8x5xf32>
    %cst_99 = arith.constant 1.000000e+00 : f32
    %149 = vector.broadcast %cst_99 : f32 to vector<8x5xf32>
    %150 = arith.subf %149, %147 : vector<8x5xf32>
    %cst_100 = arith.constant -1.000000e+08 : f32
    %151 = vector.broadcast %cst_100 : f32 to vector<8x5xf32>
    %152 = arith.mulf %150, %151 : vector<8x5xf32>
    %153 = arith.addf %148, %152 : vector<8x5xf32>
    %cst_101 = arith.constant dense<0xFF800000> : vector<8xf32>
    %154 = vector.multi_reduction <maximumf>, %153, %cst_101 [1] : vector<8x5xf32> to vector<8xf32>
    %155 = vector.shape_cast %154 : vector<8xf32> to vector<8x1xf32>
    %156 = vector.broadcast %155 : vector<8x1xf32> to vector<8x5xf32>
    %157 = arith.subf %153, %156 : vector<8x5xf32>
    %158 = math.exp %157 : vector<8x5xf32>
    %cst_102 = arith.constant dense<0.000000e+00> : vector<8xf32>
    %159 = vector.multi_reduction <add>, %158, %cst_102 [1] : vector<8x5xf32> to vector<8xf32>
    %160 = vector.shape_cast %159 : vector<8xf32> to vector<8x1xf32>
    %161 = math.log %160 : vector<8x1xf32>
    %162 = vector.broadcast %161 : vector<8x1xf32> to vector<8x5xf32>
    %163 = arith.subf %157, %162 : vector<8x5xf32>
    %164 = tpu.reciprocal %160 : vector<8x1xf32> -> vector<8x1xf32>
    %165 = vector.broadcast %164 : vector<8x1xf32> to vector<8x5xf32>
    %166 = arith.mulf %158, %165 : vector<8x5xf32>
    %c1_103 = arith.constant 1 : index
    %c0_104 = arith.constant 0 : index
    %c0_105 = arith.constant 0 : index
    %167 = vector.load %arg1[%c1_103, %c0_104, %c0_105] : memref<2x8x1xi32, #tpu.memory_space<vmem>>, vector<1x8x1xi32>
    %168 = vector.shape_cast %167 : vector<1x8x1xi32> to vector<8x1xi32>
    %169 = vector.broadcast %168 : vector<8x1xi32> to vector<8x5xi32>
    %170 = arith.cmpi eq, %1, %169 : vector<8x5xi32>
    %171 = arith.extui %170 : vector<8x5xi1> to vector<8x5xi32>
    %172 = arith.sitofp %171 : vector<8x5xi32> to vector<8x5xf32>
    %173 = arith.mulf %163, %172 : vector<8x5xf32>
    %cst_106 = arith.constant dense<0.000000e+00> : vector<8xf32>
    %174 = vector.multi_reduction <add>, %173, %cst_106 [1] : vector<8x5xf32> to vector<8xf32>
    %175 = vector.shape_cast %174 : vector<8xf32> to vector<8x1xf32>
    %176 = arith.mulf %166, %163 : vector<8x5xf32>
    %cst_107 = arith.constant dense<0.000000e+00> : vector<8xf32>
    %177 = vector.multi_reduction <add>, %176, %cst_107 [1] : vector<8x5xf32> to vector<8xf32>
    %178 = vector.shape_cast %177 : vector<8xf32> to vector<8x1xf32>
    %cst_108 = arith.constant 0.000000e+00 : f32
    %179 = vector.broadcast %cst_108 : f32 to vector<8x1xf32>
    %180 = arith.subf %179, %178 : vector<8x1xf32>
    %c0_i32_109 = arith.constant 0 : i32
    %181 = vector.broadcast %c0_i32_109 : i32 to vector<8x128xi32>
    %182 = arith.cmpi eq, %0, %181 : vector<8x128xi32>
    %c1_i32_110 = arith.constant 1 : i32
    %183 = vector.broadcast %c1_i32_110 : i32 to vector<8x128xi32>
    %184 = arith.cmpi eq, %0, %183 : vector<8x128xi32>
    %c2_i32_111 = arith.constant 2 : i32
    %185 = vector.broadcast %c2_i32_111 : i32 to vector<8x128xi32>
    %186 = arith.cmpi eq, %0, %185 : vector<8x128xi32>
    %cst_112 = arith.constant 0.000000e+00 : f32
    %187 = vector.shape_cast %180 : vector<8x1xf32> to vector<8x1xf32>
    %188 = vector.broadcast %187 : vector<8x1xf32> to vector<8x128xf32>
    %189 = vector.broadcast %cst_112 : f32 to vector<8x128xf32>
    %190 = arith.select %186, %188, %189 : vector<8x128xi1>, vector<8x128xf32>
    %191 = vector.shape_cast %175 : vector<8x1xf32> to vector<8x1xf32>
    %192 = vector.broadcast %191 : vector<8x1xf32> to vector<8x128xf32>
    %193 = arith.select %184, %192, %190 : vector<8x128xi1>, vector<8x128xf32>
    %194 = vector.shape_cast %129 : vector<8x1xf32> to vector<8x1xf32>
    %195 = vector.broadcast %194 : vector<8x1xf32> to vector<8x128xf32>
    %196 = arith.select %182, %195, %193 : vector<8x128xi1>, vector<8x128xf32>
    %c1_113 = arith.constant 1 : index
    %c0_114 = arith.constant 0 : index
    %c0_115 = arith.constant 0 : index
    %197 = vector.load %arg13[%c1_113, %c0_114, %c0_115] : memref<2x8x128xf32, #tpu.memory_space<vmem>>, vector<1x8x128xf32>
    %198 = vector.shape_cast %197 : vector<1x8x128xf32> to vector<8x128xf32>
    %199 = vector.shape_cast %196 : vector<8x128xf32> to vector<1x8x128xf32>
    tpu.vector_store %arg13[%c1_113, %c0_114, %c0_115], %199 {strides = array<i32>} : memref<2x8x128xf32, #tpu.memory_space<vmem>>, vector<1x8x128xf32>,
    return
  }
}

</mosaic_0001>

<bundles_post_ra>
// kernel: evaluate_actions.1
= control target key start
LH: loop header
LB: loop body
LE: loop exit
PB: predicated region body
PF: predicated region fallthrough
CT: control target
= control target key end

     0   :  { %vm53_vm0 = vcmask 130048   ;;  %vm86_vm1 = vcmask 261120   ;;  %s567_s18 = smov 96   ;;  %vm211_vm2 = vcmask 39936   ;;  %s832_s3 = inlined_call_operand.vmem [shape: f32[2,16,64], index: 3, kind: input, shape index: {}]   ;;  %s833_s0 = inlined_call_operand.vmem [shape: f32[2,8,16], index: 0, kind: input, shape index: {}]   ;;  %s834_s9 = inlined_call_operand.vmem [shape: f32[2,32,32], index: 9, kind: input, shape index: {}]   ;;  %s835_s4 = inlined_call_operand.vmem [shape: f32[2,1,64], index: 4, kind: input, shape index: {}]   ;;  %s836_s5 = inlined_call_operand.vmem [shape: f32[2,32,32], index: 5, kind: input, shape index: {}]   ;;  %s837_s10 = inlined_call_operand.vmem [shape: f32[2,1,32], index: 10, kind: input, shape index: {}]   ;;  %s838_s6 = inlined_call_operand.vmem [shape: f32[2,1,32], index: 6, kind: input, shape index: {}]   ;;  %s839_s11 = inlined_call_operand.vmem [shape: f32[2,32,1], index: 11, kind: input, shape index: {}]   ;;  %s840_s7 = inlined_call_operand.vmem [shape: f32[2,32,5], index: 7, kind: input, shape index: {}]   ;;  %s841_s12 = inlined_call_operand.vmem [shape: f32[2,1,1], index: 12, kind: input, shape index: {}]   ;;  %s842_s8 = inlined_call_operand.vmem [shape: f32[2,1,5], index: 8, kind: input, shape index: {}]   ;;  %s843_s2 = inlined_call_operand.vmem [shape: f32[2,8,5], index: 2, kind: input, shape index: {}]   ;;  %s844_s1 = inlined_call_operand.vmem [shape: s32[2,8,1], index: 1, kind: input, shape index: {}]   ;;  %s845_s13 = inlined_call_operand.vmem [shape: f32[2,8,128], index: 13, kind: output, shape index: {}]  }
   0x1   :  { %v48_v0 = vld [vmem:[%s832_s3 + $0x8] sm:$0xff]  ;;  %v47_v1 = vld [vmem:[%s832_s3] sm:$0xff]  ;;  %v81_v3 = vld [vmem:[%s834_s9 + $0x18] sm:$0xff] }
   0x2   :  { %71 = vmatpush.msra.mxu0 %v48_v0  ;;  %v46_v2 = vld [vmem:[%s833_s0] sm:$0xff]  ;;  %102 = vmatpush.msra.mxu1 %v81_v3  ;;  %v80_v4 = vld [vmem:[%s834_s9 + $0x10] sm:$0xff]  ;;  %v79_v5 = vld [vmem:[%s834_s9 + $0x8] sm:$0xff] }
   0x3   :  { %v78_v6 = vld [vmem:[%s834_s9] sm:$0xff]  ;;  %v508_v7 = vld [vmem:[%s832_s3 + $0x18] sm:$0xff]  ;;  %v507_v8 = vld [vmem:[%s832_s3 + $0x10] sm:$0xff] }
   0x4   :  { %72 = vmatpush.msra.mxu0 %v47_v1  ;;  %103 = vmatpush.msra.mxu1 %v80_v4  ;;  %v145_v9 = vld [vmem:[%s836_s5 + $0x18] sm:$0xff]  ;;  %v144_v10 = vld [vmem:[%s836_s5 + $0x10] sm:$0xff]  ;;  %v143_v11 = vld [vmem:[%s836_s5 + $0x8] sm:$0xff] }
   0x5   :  { %500 = vmatmul.msk.f32.vlgmr.msra.gmra.mxu0 %vm53_vm0, %v46_v2  ;;  %166 = vmatpush.msra.mxu3 %v145_v9  ;;  %v142_v12 = vld [vmem:[%s836_s5] sm:$0xff]  ;;  %v506_v17 = vld [vmem:[%s833_s0 + $0x8] sm:$0xff]  ;;  %v114_v18 = vld [vmem:[%s839_s11 + $0x18] sm:$0xff] }
   0x6   :  { %104 = vmatpush.msra.mxu1 %v79_v5  ;;  %v545_v13 = vld [vmem:[%s835_s4] ss:$0 sm:$0xff]  ;;  %134 = vmatpush.msra.mxu2 %v114_v18  ;;  %v113_v19 = vld [vmem:[%s839_s11 + $0x10] sm:$0xff]  ;;  %v112_v20 = vld [vmem:[%s839_s11 + $0x8] sm:$0xff] }
   0x7   :  { %167 = vmatpush.msra.mxu3 %v144_v10  ;;  %v111_v21 = vld [vmem:[%s839_s11] sm:$0xff]  ;;  %v514_v22 = vld [vmem:[%s834_s9 + $0x38] sm:$0xff]  ;;  %v513_v23 = vld [vmem:[%s834_s9 + $0x30] sm:$0xff] }
   0x8   :  { %105 = vmatpush.msra.mxu1 %v78_v6  ;;  %135 = vmatpush.msra.mxu2 %v113_v19  ;;  %v512_v24 = vld [vmem:[%s834_s9 + $0x28] sm:$0xff]  ;;  %v511_v25 = vld [vmem:[%s834_s9 + $0x20] sm:$0xff]  ;;  %v178_v26 = vld [vmem:[%s840_s7 + $0x18] sm:$0xff] }
   0x9   :  { %168 = vmatpush.msra.mxu3 %v143_v11  ;;  %v177_v27 = vld [vmem:[%s840_s7 + $0x10] sm:$0xff]  ;;  %198 = vmatpush.msrb.mxu0 %v178_v26  ;;  %v546_v29 = vld [vmem:[%s837_s10] ss:$0 sm:$0xff]  ;;  %v547_v33 = vld [vmem:[%s835_s4 + $0x1] ss:$0 sm:$0xff]  ;;  %v568_v11 = vmov 0   ;;  %v44_v26 = vlaneseq }
   0xa   :  { %294 = vmatpush.msrb.mxu1 %v508_v7  ;;  %136 = vmatpush.msra.mxu2 %v112_v20  ;;  %v176_v37 = vld [vmem:[%s840_s7 + $0x8] sm:$0xff]  ;;  %v175_v38 = vld [vmem:[%s840_s7] sm:$0xff]  ;;  %v526_v39 = vld [vmem:[%s836_s5 + $0x38] sm:$0xff] }
   0xb   :  { %169 = vmatpush.msra.mxu3 %v142_v12  ;;  %199 = vmatpush.msrb.mxu0 %v177_v27  ;;  %v525_v40 = vld [vmem:[%s836_s5 + $0x30] sm:$0xff]  ;;  %v524_v41 = vld [vmem:[%s836_s5 + $0x28] sm:$0xff]  ;;  %v523_v42 = vld [vmem:[%s836_s5 + $0x20] sm:$0xff] }
   0xc   :  { %295 = vmatpush.msrb.mxu1 %v507_v8  ;;  %137 = vmatpush.msra.mxu2 %v111_v21  ;;  %v520_v43 = vld [vmem:[%s839_s11 + $0x38] sm:$0xff]  ;;  %v519_v44 = vld [vmem:[%s839_s11 + $0x30] sm:$0xff]  ;;  %v518_v45 = vld [vmem:[%s839_s11 + $0x28] sm:$0xff] }
   0xd   :  { %200 = vmatpush.msrb.mxu0 %v176_v37  ;;  %360 = vmatpush.msrb.mxu3 %v520_v43  ;;  %v517_v46 = vld [vmem:[%s839_s11 + $0x20] sm:$0xff]  ;;  %v532_v57 = vld [vmem:[%s840_s7 + $0x38] sm:$0xff]  ;;  %v531_v58 = vld [vmem:[%s840_s7 + $0x30] sm:$0xff] }
   0xe   :  { %326 = vmatpush.msrb.mxu2 %v514_v22  ;;  %v548_v47 = vld [vmem:[%s838_s6] ss:$0 sm:$0xff]  ;;  %v550_v53 = vld [vmem:[%s837_s10 + $0x1] ss:$0 sm:$0xff]  ;;  %v530_v59 = vld [vmem:[%s840_s7 + $0x28] sm:$0xff]  ;;  %542 = vset.pattern.permute.xlu0 %v568_v11 }
   0xf   :  { %201 = vmatpush.msrb.mxu0 %v175_v38  ;;  %361 = vmatpush.msrb.mxu3 %v519_v44  ;;  %v529_v60 = vld [vmem:[%s840_s7 + $0x20] sm:$0xff] }
  0x10   :  { %327 = vmatpush.msrb.mxu2 %v513_v23  ;;  %v206_v61 = vld [vmem:[%s843_s2] sm:$0xff]  ;;  %543 = vset.pattern.permute.xlu2 %v568_v11 }
  0x11   :  { %394 = vmatpush.msra.mxu0 %v526_v39  ;;  %362 = vmatpush.msrb.mxu3 %v518_v45  ;;  %v551_v62 = vld [vmem:[%s842_s8] ss:$0 sm:$0xff]  ;;  %v208_v63 = vsub.f32 1.0, %v206_v61  ;;  %v552_v5 = vld [vmem:[%s838_s6 + $0x1] ss:$0 sm:$0xff] }
  0x12   :  { %328 = vmatpush.msrb.mxu2 %v512_v24  ;;  %v239_v10 = vld [vmem:[%s844_s1] sm:$0xff]  ;;  %544 = vset.pattern.permute.xlu1 %v568_v11 }
  0x13   :  { %395 = vmatpush.msra.mxu0 %v525_v40  ;;  %363 = vmatpush.msrb.mxu3 %v517_v46  ;;  %v209_v2 = vmul.f32 -1e+08, %v208_v63  ;;  %v554_v18 = vld [vmem:[%s842_s8 + $0x1] ss:$0 sm:$0xff] }
  0x14   :  { %329 = vmatpush.msrb.mxu2 %v511_v25 }
  0x15   :  { %396 = vmatpush.msra.mxu0 %v524_v41 }
  0x17   :  { %397 = vmatpush.msra.mxu0 %v523_v42 }
  0x82   :  { %v74_v14 = vpop.f32.mrf.mxu0 }
  0x83   :  { %v75_v15 = vadd.f32 %v545_v13, %v74_v14 }
  0x85   :  { %v77_v16 = vmax.f32 %v75_v15, 0.0  ;;  %v535_v15 = vld [vmem:[%s843_s2 + $0x8] sm:$0xff] }
  0x86   :  { %v439_v19 = vsub.f32 1.0, %v535_v15 }
  0x87   :  { %150 = vrot.lane.b32.xlu0 %v77_v16, %s567_s18  ;;  %501 = vmatmul.msk.f32.vlgmr.msra.gmra.mxu1 %vm86_vm1, %v77_v16 }
  0x88   :  { %428 = vmatpush.msra.mxu1 %v532_v57  ;;  %v440_v22 = vmul.f32 -1e+08, %v439_v19  ;;  %v553_v57 = vld [vmem:[%s841_s12 + $0x1] ss:$0 sm:$0xff] }
  0x8a   :  { %429 = vmatpush.msra.mxu1 %v531_v58 }
  0x8c   :  { %430 = vmatpush.msra.mxu1 %v530_v59 }
  0x8e   :  { %431 = vmatpush.msra.mxu1 %v529_v60 }
  0x8f   :  { %510 = vmatmul.msk.f32.vlgmr.msrb.gmra.mxu1 %vm53_vm0, %v506_v17 }
  0xf9   :  { %v151_v28 = vpop.permute.xlu0 %150 }
  0xfa   :  { %503 = vmatmul.msk.f32.vlgmr.msra.gmra.mxu3 %vm86_vm1, %v151_v28  ;;  %v804_v28 = vand.u32 127, %v44_v26 }
  0xfc   :  { %vm257_vm13 = vcmp.eq.s32.totalorder %v804_v28, 2  ;;  %vm255_vm14 = vcmp.eq.s32.totalorder %v804_v28, 0  ;;  %vm256_vm15 = vcmp.eq.s32.totalorder %v804_v28, 1 }
 0x104   :  { %v107_v30 = vpop.f32.mrf.mxu1 }
 0x105   :  { %v108_v31 = vadd.f32 %v546_v29, %v107_v30 }
 0x107   :  { %v110_v32 = vmax.f32 %v108_v31, 0.0 }
 0x109   :  { %502 = vmatmul.msk.f32.vlgmr.msra.gmra.mxu2 %vm86_vm1, %v110_v32 }
 0x10c   :  { %v297_v34 = vpop.f32.mrf.mxu1 }
 0x10d   :  { %v298_v35 = vadd.f32 %v547_v33, %v297_v34 }
 0x10f   :  { %v300_v36 = vmax.f32 %v298_v35, 0.0  ;;  %v569_v35 = vmov 0.0  }
 0x111   :  { %378 = vrot.lane.b32.xlu0 %v300_v36, %s567_s18  ;;  %516 = vmatmul.msk.f32.vlgmr.msrb.gmra.mxu2 %vm86_vm1, %v300_v36 }
 0x119   :  { %241 = vperm.xlu0 %542, %v239_v10  }
 0x17d   :  { %v171_v48 = vpop.f32.mrf.mxu3 }
 0x17e   :  { %v172_v49 = vadd.f32 %v548_v47, %v171_v48 }
 0x180   :  { %v174_v50 = vmax.f32 %v172_v49, 0.0 }
 0x182   :  { %504 = vmatmul.msk.f32.vlgmr.msrb.gmra.mxu0 %vm86_vm1, %v174_v50 }
 0x183   :  { %v379_v51 = vpop.permute.xlu0 %378 }
 0x18a   :  { %528 = vmatmul.msk.f32.vlgmr.msra.gmra.mxu0 %vm86_vm1, %v379_v51 }
 0x18b   :  { %v242_v29 = vpop.permute.xlu0 %241 }
 0x18c   :  { %v764_v52 = vpop.f32.mrf.mxu2  ;;  %vm243_vm3 = vcmp.eq.s32.totalorder %v804_v28, %v242_v29 }
 0x18d   :  { %v505_v36 = vsel %vm243_vm3, 1.0, %v569_v35 }
 0x194   :  { %v331_v54 = vpop.f32.mrf.mxu2 }
 0x195   :  { %v332_v55 = vadd.f32 %v550_v53, %v331_v54 }
 0x197   :  { %v334_v56 = vmax.f32 %v332_v55, 0.0 }
 0x199   :  { %522 = vmatmul.msk.f32.vlgmr.msrb.gmra.mxu3 %vm86_vm1, %v334_v56  ;;  %v536_v56 = vld [vmem:[%s844_s1 + $0x8] sm:$0xff] }
 0x1ff   :  { %v203_v0 = vpop.f32.mrf.mxu0 }
 0x200   :  { %v204_v1 = vadd.f32 %v551_v62, %v203_v0 }
 0x202   :  { %v207_v3 = vmul.f32 %v206_v61, %v204_v1 }
 0x204   :  { %v210_v4 = vadd.f32 %v209_v2, %v207_v3 }
 0x206   :  { %v212_v6 = vsel %vm211_vm2, %v210_v4, -inf }
 0x207   :  { %213 = vmax.xlane.f32.xlu1 %v212_v6  ;;  %v399_v7 = vpop.f32.mrf.mxu0 }
 0x208   :  { %v400_v8 = vadd.f32 %v552_v5, %v399_v7 }
 0x20a   :  { %v402_v9 = vmax.f32 %v400_v8, 0.0 }
 0x20c   :  { %534 = vmatmul.msk.f32.vlgmr.msra.gmra.mxu1 %vm86_vm1, %v402_v9 }
 0x21c   :  { %v365_v58 = vpop.f32.mrf.mxu3 }
 0x21d   :  { %v366_v59 = vadd.f32 %v553_v57, %v365_v58 }
 0x27a   :  { %v214_v12 = vpop.xlane.xlu1 %213 }
 0x27b   :  { %v215_v13 = vsub.f32 %v210_v4, %v214_v12 }
 0x27d   :  { %v216_v14 = vmul.f32 1.442695, %v215_v13 }
 0x27f   :  { %555 = vpow2.f32 %v216_v14 }
 0x285   :  { %v556_v16 = vpop.eup %555 }
 0x286   :  { %v218_v17 = vsel %vm211_vm2, %v556_v16, 0.0 }
 0x287   :  { %219 = vadd.xlane.f32.xlu2 %v218_v17  ;;  %v549_v17 = vld [vmem:[%s841_s12] ss:$0 sm:$0xff] }
 0x289   :  { %v433_v20 = vpop.f32.mrf.mxu1 }
 0x28a   :  { %v434_v21 = vadd.f32 %v554_v18, %v433_v20  ;;  %v140_v18 = vadd.f32 %v549_v17, %v764_v52 }
 0x28c   :  { %v438_v23 = vmul.f32 %v535_v15, %v434_v21 }
 0x28e   :  { %v441_v24 = vadd.f32 %v440_v22, %v438_v23 }
 0x290   :  { %v442_v25 = vsel %vm211_vm2, %v441_v24, -inf }
 0x291   :  { %443 = vmax.xlane.f32.xlu1 %v442_v25 }
 0x2fa   :  { %v220_v27 = vpop.xlane.xlu2 %219 }
 0x2fb   :  { %557 = vrcp.f32 %v220_v27  ;;  %v235_v40 = vand.u32 2147483648, %v220_v27  ;;  %v233_v42 = vand.u32 2147483647, %v220_v27  ;;  %vm229_vm5 = vweird.f32 %v220_v27 }
 0x2fc   :  { %559 = vlog2.f32 %v220_v27 }
 0x2fd   :  { %v236_v47 = vor.u32 1.1754944e-38, %v235_v40  ;;  %vm234_vm7 = vcmp.eq.f32.partialorder %v233_v42, 8.507059e+37 }
 0x301   :  { %v558_v30 = vpop.eup %557 }
 0x302   :  { %v560_v31 = vpop.eup %559  ;;  %v225_v32 = vmul.f32 %v558_v30, %v220_v27  ;;  %vm230_vm4 = vweird.f32 %v558_v30 }
 0x303   :  { %v222_v33 = vmul.f32 0.6931472, %v560_v31  ;;  %vm231_vm6 = vmor %vm229_vm5, %vm230_vm4 }
 0x304   :  { %v226_v34 = vsub.f32 1.0, %v225_v32  ;;  %v444_v37 = vpop.xlane.xlu1 %443 }
 0x305   :  { %v445_v38 = vsub.f32 %v441_v24, %v444_v37  ;;  %v223_v39 = vsub.f32 %v215_v13, %v222_v33 }
 0x306   :  { %v227_v41 = vmul.f32 %v558_v30, %v226_v34 }
 0x307   :  { %v446_v43 = vmul.f32 1.442695, %v445_v38  ;;  %v246_v44 = vmul.f32 %v505_v36, %v223_v39 }
 0x308   :  { %v228_v45 = vadd.f32 %v558_v30, %v227_v41 }
 0x309   :  { %561 = vpow2.f32 %v446_v43  ;;  %v247_v46 = vsel %vm211_vm2, %v246_v44, 0.0 }
 0x30a   :  { %248 = vadd.xlane.f32.xlu1 %v247_v46  ;;  %v232_v48 = vsel %vm231_vm6, %v558_v30, %v228_v45 }
 0x30b   :  { %v237_v49 = vsel %vm234_vm7, %v236_v47, %v232_v48 }
 0x30c   :  { %v238_v50 = vmul.f32 %v556_v16, %v237_v49 }
 0x30e   :  { %v250_v51 = vmul.f32 %v238_v50, %v223_v39 }
 0x30f   :  { %v562_v53 = vpop.eup %561 }
 0x310   :  { %v448_v54 = vsel %vm211_vm2, %v562_v53, 0.0  ;;  %v251_v55 = vsel %vm211_vm2, %v250_v51, 0.0 }
 0x311   :  { %449 = vadd.xlane.f32.xlu2 %v448_v54 }
 0x312   :  { %252 = vadd.xlane.f32.xlu1 %v251_v55 }
 0x329   :  { %472 = vperm.xlu2 %543, %v536_v56  }
 0x331   :  { %490 = vperm.xlu2 %543, %v366_v59  }
 0x37d   :  { %v249_v19 = vpop.xlane.xlu1 %248 }
 0x384   :  { %v450_v60 = vpop.xlane.xlu2 %449 }
 0x385   :  { %563 = vrcp.f32 %v450_v60  ;;  %v465_v5 = vand.u32 2147483648, %v450_v60  ;;  %v463_v7 = vand.u32 2147483647, %v450_v60  ;;  %vm459_vm10 = vweird.f32 %v450_v60  ;;  %v253_v20 = vpop.xlane.xlu1 %252 }
 0x386   :  { %565 = vlog2.f32 %v450_v60  ;;  %v254_v52 = vsub.f32 0.0, %v253_v20 }
 0x387   :  { %v466_v11 = vor.u32 1.1754944e-38, %v465_v5  ;;  %vm464_vm12 = vcmp.eq.f32.partialorder %v463_v7, 8.507059e+37 }
 0x388   :  { %v258_v29 = vsel %vm257_vm13, %v254_v52, 0.0 }
 0x389   :  { %v259_v30 = vsel %vm256_vm15, %v249_v19, %v258_v29 }
 0x38b   :  { %v564_v61 = vpop.eup %563 }
 0x38c   :  { %v566_v62 = vpop.eup %565  ;;  %v455_v63 = vmul.f32 %v564_v61, %v450_v60  ;;  %v473_v0 = vpop.permute.xlu2 %472  ;;  %vm460_vm9 = vweird.f32 %v564_v61 }
 0x38d   :  { %vm474_vm8 = vcmp.eq.s32.totalorder %v804_v28, %v473_v0  ;;  %v452_v1 = vmul.f32 0.6931472, %v566_v62  ;;  %vm461_vm11 = vmor %vm459_vm10, %vm460_vm9 }
 0x38e   :  { %v456_v2 = vsub.f32 1.0, %v455_v63  ;;  %v537_v3 = vsel %vm474_vm8, 1.0, %v569_v35 }
 0x38f   :  { %v453_v4 = vsub.f32 %v445_v38, %v452_v1 }
 0x390   :  { %v457_v6 = vmul.f32 %v564_v61, %v456_v2 }
 0x391   :  { %v477_v8 = vmul.f32 %v537_v3, %v453_v4 }
 0x392   :  { %v458_v9 = vadd.f32 %v564_v61, %v457_v6 }
 0x393   :  { %v478_v10 = vsel %vm211_vm2, %v477_v8, 0.0 }
 0x394   :  { %479 = vadd.xlane.f32.xlu1 %v478_v10  ;;  %v462_v12 = vsel %vm461_vm11, %v564_v61, %v458_v9  ;;  %v491_v25 = vpop.permute.xlu2 %490 }
 0x395   :  { %v467_v13 = vsel %vm464_vm12, %v466_v11, %v462_v12 }
 0x396   :  { %v468_v14 = vmul.f32 %v562_v53, %v467_v13 }
 0x398   :  { %v481_v15 = vmul.f32 %v468_v14, %v453_v4 }
 0x39a   :  { %v482_v16 = vsel %vm211_vm2, %v481_v15, 0.0 }
 0x39b   :  { %483 = vadd.xlane.f32.xlu0 %v482_v16 }
 0x3ad   :  { %262 = vperm.xlu1 %544, %v140_v18  }
 0x407   :  { %v480_v23 = vpop.xlane.xlu1 %479 }
 0x40e   :  { %v484_v21 = vpop.xlane.xlu0 %483 }
 0x40f   :  { %v485_v22 = vsub.f32 0.0, %v484_v21 }
 0x411   :  { %v486_v24 = vsel %vm257_vm13, %v485_v22, 0.0 }
 0x412   :  { %v487_v26 = vsel %vm256_vm15, %v480_v23, %v486_v24 }
 0x413   :  { %v493_v27 = vsel %vm255_vm14, %v491_v25, %v487_v26 }
 0x414   :  { %538 = vst [vmem:[%s845_s13 + $0x8] sm:$0xff] %v493_v27 }
 0x41f   :  { %v263_v31 = vpop.permute.xlu1 %262 }
 0x420   :  { %v265_v32 = vsel %vm255_vm14, %v263_v31, %v259_v30 }
 0x421   :  { %266 = vst [vmem:[%s845_s13] sm:$0xff] %v265_v32 }

</bundles_post_ra>
